<compile_context>
chip_gen: v5e
topology: v5e:2x2
jax: 0.10.0
libtpu: 0.0.40
codegen_flags: <defaults>
</compile_context>

<pallas_src>
import jax
import jax.numpy as jnp
from jax.experimental import pallas as pl
from jax.experimental.pallas import tpu as pltpu


def _terminal_cost_kernel(params_ref, x_ref, out_ref):
    # params_ref : (4,)        SMEM f32 -- [goal_x, goal_y, goal_z, weight]
    # x_ref      : (3, ts, L)  VMEM f32 -- x/y/z planes; batch on sublanes x lanes
    # out_ref    : (ts, L)     VMEM f32 -- weighted L2 distance per batch element
    dx = x_ref[0] - params_ref[0]          # scalar-broadcast VPU sub, fully dense
    dy = x_ref[1] - params_ref[1]
    dz = x_ref[2] - params_ref[2]
    sq = dx * dx + dy * dy + dz * dz       # (ts, L): pure VPU, no XLU lane-reduce
    out_ref[...] = params_ref[3] * jnp.sqrt(sq)


def _round_up(x, m):
    return ((x + m - 1) // m) * m


def terminal_cost(ee_pos_batch, ee_goal_pos, *, weight, horizon):
    """JAX/Pallas equivalent of terminalCost.forward."""
    ee_pos_batch = ee_pos_batch.astype(jnp.float32)
    B, _, D = ee_pos_batch.shape
    assert D == 3, D

    # ---- choose a sublane x lane layout for the batch -------------------------
    L = min(_round_up(B, 128), 1024)       # lane width (multiple of 128)
    S = pl.cdiv(B, L)                      # sublane rows needed
    TS_MAX = 256                           # max sublane rows / block (~3 MiB in, 1 MiB out)
    in_bytes = 3 * S * L * 4
    if S > TS_MAX:
        ts = TS_MAX                        # multiple of 8
        S_pad = _round_up(S, ts)
    elif S >= 16 and in_bytes >= (1 << 20):
        ts = _round_up(pl.cdiv(S, 2), 8)   # >= 2 blocks so v7x uses both TensorCores
        S_pad = 2 * ts
    else:
        ts = S                             # single block covering the full dims
        S_pad = S
    n_blocks = S_pad // ts
    B_pad = S_pad * L

    # ---- glue (fuses into one XLA gather/pad copy): horizon slice -> (3,S,L) --
    x_t = jnp.transpose(ee_pos_batch[:, horizon, :])          # (3, B)
    if B_pad != B:
        x_t = jnp.pad(x_t, ((0, 0), (0, B_pad - B)))          # (3, B_pad)
    x3 = x_t.reshape(3, S_pad, L)                              # free reshape

    # goal xyz + weight packed as SMEM scalars (no recompile when weight changes).
    params = jnp.concatenate([
        ee_goal_pos.reshape(-1).astype(jnp.float32),
        jnp.asarray(weight, dtype=jnp.float32).reshape(1),
    ])                                                         # (4,)

    out = pl.pallas_call(
        _terminal_cost_kernel,
        out_shape=jax.ShapeDtypeStruct((S_pad, L), jnp.float32),
        grid=(n_blocks,),
        in_specs=[
            pl.BlockSpec(memory_space=pltpu.MemorySpace.SMEM),   # (4,) scalars in SMEM
            pl.BlockSpec((3, ts, L), lambda i: (0, i, 0)),       # dense xyz planes
        ],
        out_specs=pl.BlockSpec((ts, L), lambda i: (i, 0)),       # dense, unmasked stores
        compiler_params=pltpu.CompilerParams(
            dimension_semantics=("parallel",),
            vmem_limit_bytes=32 * 1024 * 1024,   # headroom for v5e's 16 MiB scoped default
        ),
    )(params, x3)
    return out.reshape(-1)[:B]                                   # (B,)


if __name__ == "__main__":
    # Deterministic parameters (terminalCost.__init__ takes weight + horizon).
    weight = 100.0
    horizon = 7          # index into the horizon axis (here: last step of H=8)

    key = jax.random.PRNGKey(0)
    k1, k2 = jax.random.split(key)
    B, H, D = 2, 8, 3
    ee_pos_batch = jax.random.normal(k1, (B, H, D), dtype=jnp.float32)
    ee_goal_pos = jax.random.normal(k2, (D,), dtype=jnp.float32)

    cost = terminal_cost(ee_pos_batch, ee_goal_pos, weight=weight, horizon=horizon)
    cost = jax.block_until_ready(cost)

    # Reference in plain JAX for a sanity check.
    ref = weight * jnp.linalg.norm(
        ee_pos_batch[:, horizon, :] - ee_goal_pos[None, :], ord=2, axis=1
    )
    assert cost.shape == (B,), cost.shape
    assert jnp.allclose(cost, ref, rtol=1e-5, atol=1e-5), (cost, ref)

    print("KERNEL_OK")
</pallas_src>

<mosaic_0001>
module attributes {stable_mosaic.version = 11 : i64} {
  func.func @_terminal_cost_kernel(%arg0: i32, %arg1: memref<4xf32, #tpu.memory_space<smem>>, %arg2: memref<3x1x128xf32, #tpu.memory_space<vmem>>, %arg3: memref<1x128xf32, #tpu.memory_space<vmem>>) attributes {dimension_semantics = [#tpu.dimension_semantics<parallel>], iteration_bounds = array<i64: 1>, scalar_prefetch = 0 : i64, scratch_operands = 0 : i64, tpu.core_type = #tpu.core_type<tc>, window_params = [{transform_indices = @transform_0, window_bounds = array<i64: 4>}, {transform_indices = @transform_1, window_bounds = array<i64: 3, 1, 128>}, {transform_indices = @transform_2, window_bounds = array<i64: 1, 128>}]} {
    %c0 = arith.constant 0 : index
    %c0_0 = arith.constant 0 : index
    %c0_1 = arith.constant 0 : index
    %0 = vector.load %arg2[%c0, %c0_0, %c0_1] : memref<3x1x128xf32, #tpu.memory_space<vmem>>, vector<1x1x128xf32>
    %1 = vector.shape_cast %0 : vector<1x1x128xf32> to vector<1x128xf32>
    %c0_2 = arith.constant 0 : index
    %2 = memref.load %arg1[%c0_2] : memref<4xf32, #tpu.memory_space<smem>>
    %3 = vector.broadcast %2 : f32 to vector<1x128xf32>
    %4 = arith.subf %1, %3 : vector<1x128xf32>
    %c1 = arith.constant 1 : index
    %c0_3 = arith.constant 0 : index
    %c0_4 = arith.constant 0 : index
    %5 = vector.load %arg2[%c1, %c0_3, %c0_4] : memref<3x1x128xf32, #tpu.memory_space<vmem>>, vector<1x1x128xf32>
    %6 = vector.shape_cast %5 : vector<1x1x128xf32> to vector<1x128xf32>
    %c1_5 = arith.constant 1 : index
    %7 = memref.load %arg1[%c1_5] : memref<4xf32, #tpu.memory_space<smem>>
    %8 = vector.broadcast %7 : f32 to vector<1x128xf32>
    %9 = arith.subf %6, %8 : vector<1x128xf32>
    %c2 = arith.constant 2 : index
    %c0_6 = arith.constant 0 : index
    %c0_7 = arith.constant 0 : index
    %10 = vector.load %arg2[%c2, %c0_6, %c0_7] : memref<3x1x128xf32, #tpu.memory_space<vmem>>, vector<1x1x128xf32>
    %11 = vector.shape_cast %10 : vector<1x1x128xf32> to vector<1x128xf32>
    %c2_8 = arith.constant 2 : index
    %12 = memref.load %arg1[%c2_8] : memref<4xf32, #tpu.memory_space<smem>>
    %13 = vector.broadcast %12 : f32 to vector<1x128xf32>
    %14 = arith.subf %11, %13 : vector<1x128xf32>
    %15 = arith.mulf %4, %4 : vector<1x128xf32>
    %16 = arith.mulf %9, %9 : vector<1x128xf32>
    %17 = arith.addf %15, %16 : vector<1x128xf32>
    %18 = arith.mulf %14, %14 : vector<1x128xf32>
    %19 = arith.addf %17, %18 : vector<1x128xf32>
    %c3 = arith.constant 3 : index
    %20 = memref.load %arg1[%c3] : memref<4xf32, #tpu.memory_space<smem>>
    %21 = math.sqrt %19 : vector<1x128xf32>
    %22 = vector.broadcast %20 : f32 to vector<1x128xf32>
    %23 = arith.mulf %22, %21 : vector<1x128xf32>
    %c0_9 = arith.constant 0 : index
    %c0_10 = arith.constant 0 : index
    %24 = vector.load %arg3[%c0_9, %c0_10] : memref<1x128xf32, #tpu.memory_space<vmem>>, vector<1x128xf32>
    tpu.vector_store %arg3[%c0_9, %c0_10], %23 {strides = array<i32>} : memref<1x128xf32, #tpu.memory_space<vmem>>, vector<1x128xf32>,
    return
  }
  func.func @transform_0(%arg0: i32) -> i32 {
    %c0_i32 = arith.constant 0 : i32
    %c0_i32_0 = arith.constant 0 : i32
    return %c0_i32 : i32
  }
  func.func @transform_1(%arg0: i32) -> (i32, i32, i32) {
    %c0_i32 = arith.constant 0 : i32
    %c0_i32_0 = arith.constant 0 : i32
    %c0_i32_1 = arith.constant 0 : i32
    return %c0_i32, %arg0, %c0_i32_0 : i32, i32, i32
  }
  func.func @transform_2(%arg0: i32) -> (i32, i32) {
    %c0_i32 = arith.constant 0 : i32
    %c0_i32_0 = arith.constant 0 : i32
    return %arg0, %c0_i32 : i32, i32
  }
}

</mosaic_0001>

<bundles_post_ra>
// kernel: tpu_custom_call.1
= control target key start
LH: loop header
LB: loop body
LE: loop exit
PB: predicated region body
PF: predicated region fallthrough
CT: control target
= control target key end

     0   :  { %7 = vsyncpa [#allocation5], 0  ;;  %s199_s0 = inlined_call_operand.hbm [shape: f32[4], index: 0, kind: input, shape index: {}]   ;;  %s200_s1 = inlined_call_operand.hbm [shape: f32[3,1,128], index: 1, kind: input, shape index: {}]   ;;  %s201_s2 = inlined_call_operand.hbm [shape: f32[1,128], index: 2, kind: output, shape index: {}]  }
   0x1   :  { %8 = vsyncpa [#allocation3], 0 }
   0x2   :  { %9 = vsyncpa [#allocation4], 0  ;;  %s15_s11 = sshll.u32 %s199_s0, 4  ;;  %s23_s14 = sshll.u32 %s200_s1, 4  ;;  %s16_s11 = int_to_ptr.hbm [resolvable:$true] %s15_s11  ;;  %s24_s14 = int_to_ptr.hbm [resolvable:$true] %s23_s14 }
   0x3   :  { %s170_s15 = smov [#allocation2]   ;;  %s171_s16 = smov [#allocation6]  }
   0x4   :  { %18 = dma.hbm_to_smem %s16_s11, 16, %s170_s15, [#allocation5]  }
   0x5   :  { %s25_s17 = sshll.u32 %s171_s16, 4  ;;  %s172_s18 = smov 16   ;;  %s26_s17 = int_to_ptr.vmem [resolvable:$true] %s25_s17 }
   0x6   :  { %s173_s19 = smov 1  }
   0x7   :  { %31 = dma.hbm_to_vmem [thread:$0]  %s24_s14, 48, %s26_s17, [#allocation3], %s172_s18, %s172_s18, %s173_s19  }
   0x8   :  { %164 = dma.done.wait [#allocation5], 16  }
   0x9   :  { %165 = vsyncadd [#allocation5], 4294967280 }
   0xa   :  { %166 = dma.done.wait [#allocation3], 48  }
   0xb   :  { %167 = vsyncadd [#allocation3], 4294967248 }
   0xc   :  { %40 = sfence }
   0xd   :  { %s42_s0 = sld [smem:[#allocation2]]  ;;  %v41_v0 = vld [vmem:[#allocation6] sm:$0x1]  ;;  %v46_v1 = vld [vmem:[#allocation6 + $0x1] sm:$0x1]  ;;  %s174_s22 = smov [#allocation7]  }
   0xe   :  { %s94_s20 = sld [smem:[#allocation2 + $0x1]]  ;;  %v51_v3 = vld [vmem:[#allocation6 + $0x2] sm:$0x1]  ;;  %s81_s23 = sshll.u32 %s174_s22, 4  ;;  %s82_s23 = int_to_ptr.vmem [resolvable:$true] %s81_s23 }
   0xf   :  { %s95_s21 = sld [smem:[#allocation2 + $0x2]]  ;;  %s83_s26 = sshll.u32 %s201_s2, 4  ;;  %s84_s26 = int_to_ptr.hbm [resolvable:$true] %s83_s26 }
  0x10   :  { %s96_s1 = sld [smem:[#allocation2 + $0x3]] }
  0x13   :  { %v43_v2 = vstv %s42_s0 }
  0x14   :  { %v44_v4 = vsub.f32 %v41_v0, %v43_v2  ;;  %v48_v5 = vstv %s94_s20 }
  0x15   :  { %v49_v6 = vsub.f32 %v46_v1, %v48_v5  ;;  %v53_v7 = vstv %s95_s21 }
  0x16   :  { %v54_v8 = vsub.f32 %v51_v3, %v53_v7  ;;  %v55_v9 = vmul.f32 %v44_v4, %v44_v4  ;;  %v73_v22 = vstv %s96_s1 }
  0x17   :  { %v56_v10 = vmul.f32 %v49_v6, %v49_v6 }
  0x18   :  { %v58_v11 = vmul.f32 %v54_v8, %v54_v8 }
  0x19   :  { %v57_v12 = vadd.f32 %v56_v10, %v55_v9 }
  0x1b   :  { %v59_v13 = vadd.f32 %v58_v11, %v57_v12 }
  0x1d   :  { %102 = vrsqrt.f32 %v59_v13  ;;  %vm68_vm0 = vcmp.eq.f32.partialorder %v59_v13, inf  ;;  %v71_v20 = vand.u32 2147483648, %v59_v13  ;;  %vm70_vm1 = vcmp.eq.f32.partialorder %v59_v13, 0.0 }
  0x23   :  { %v103_v14 = vpop.eup %102 }
  0x24   :  { %v62_v15 = vmul.f32 %v103_v14, %v59_v13 }
  0x26   :  { %v63_v16 = vmul.f32 %v103_v14, %v62_v15 }
  0x28   :  { %v64_v17 = vmul.f32 0.5, %v63_v16 }
  0x2a   :  { %v65_v18 = vsub.f32 1.5, %v64_v17 }
  0x2c   :  { %v66_v19 = vmul.f32 %v103_v14, %v65_v18 }
  0x2e   :  { %v67_v21 = vmul.f32 %v66_v19, %v59_v13 }
  0x30   :  { %v69_v23 = vsel %vm68_vm0, %v59_v13, %v67_v21 }
  0x31   :  { %v72_v24 = vsel %vm70_vm1, %v71_v20, %v69_v23 }
  0x32   :  { %v74_v25 = vmul.f32 %v73_v22, %v72_v24 }
  0x34   :  { %75 = vst [vmem:[#allocation7] sm:$0x1] %v74_v25 }
  0x35   :  { %86 = dma.vmem_to_hbm [thread:$0]  %s82_s23, 16, %s84_s26, [#allocation4]  }
  0x36   :  { %168 = dma.done.wait [#allocation4], 16  }
  0x37   :  { %169 = vsyncadd [#allocation4], 4294967280 }
  0x38   :  { %91 = vsyncpa [#allocation3], 1 }
  0x39   :  { %92 = vsyncpa [#allocation4], 1 }
  0x3a   :  { %93 = vsyncpa [#allocation5], 1 }

</bundles_post_ra>
